<compile_context>
chip_gen: v5e
topology: v5e:2x2
jax: 0.10.0
libtpu: 0.0.40
codegen_flags: <defaults>
</compile_context>

<pallas_src>
import functools

import jax
import jax.numpy as jnp
from jax import lax
from jax.experimental import pallas as pl
from jax.experimental.pallas import tpu as pltpu


def _make_ce_kernel(n_total: int, tile_n: int):
    """Per-(batch, n-tile) cross-entropy partial sum."""

    def ce_kernel(logits_ref, y_ref, out_ref):
        n_blk = pl.program_id(1)

        x = logits_ref[...].astype(jnp.float32)             # (1, C, TN)
        labels = y_ref[...]                                  # (1, 1, TN) int32

        # numerically stable log-sum-exp over the class (sublane) axis
        m = jnp.max(x, axis=1, keepdims=True)                # (1, 1, TN)
        lse = m + jnp.log(jnp.sum(jnp.exp(x - m), axis=1, keepdims=True))

        # gather the target logit via one-hot select (no per-lane gather on TPU)
        cls = lax.broadcasted_iota(jnp.int32, x.shape, 1)     # (1, C, TN)
        tgt = jnp.sum(jnp.where(cls == labels, x, 0.0), axis=1, keepdims=True)

        loss_pt = lse - tgt                                    # (1, 1, TN)

        # mask lanes past the true point count (ragged last tile); the garbage
        # values in padded lanes are selected away, never summed.
        lane = lax.broadcasted_iota(jnp.int32, loss_pt.shape, 2)
        valid = (n_blk * tile_n + lane) < n_total
        tile_sum = jnp.sum(jnp.where(valid, loss_pt, 0.0))

        # lane-dense partial-sum block; lane 0 is read back outside
        out_ref[...] = jnp.broadcast_to(tile_sum, out_ref.shape)

    return ce_kernel


def _pick_tile_n(n: int, c: int, tile_n: int, in_bytes: int) -> int:
    """Largest lane tile that (a) is a multiple of 128 when tiling, (b) keeps
    the double-buffered logits block under ~8 MiB of VMEM."""
    if n <= tile_n:
        return n
    budget = 8 * 1024 * 1024  # per logits buffer (x2 for double buffering)
    max_tn = max(128, (budget // max(1, c * in_bytes)) // 128 * 128)
    tn = min(tile_n, max_tn)
    assert tn % 128 == 0
    return tn


@functools.partial(jax.jit, static_argnames=("eps", "tile_n"))
def part_seg_loss(logits, y, eps: float = 0.2, tile_n: int = 2048):
    """JAX/Pallas equivalent of PartSegLoss.forward(logits, y).

    logits: (B, C, N) float (any float dtype; math is f32 inside the kernel)
    y:      (B*N,) int labels in [0, C), ordered as b*N + n (matches the
            PyTorch permute(0,2,1).view(-1, C) row order)
    returns scalar float32 mean cross-entropy.
    """
    del eps  # stored by the PyTorch module but never applied to the loss
    B, C, N = logits.shape
    M = B * N

    tn = _pick_tile_n(N, C, tile_n, jnp.dtype(logits.dtype).itemsize)
    n_blocks = pl.cdiv(N, tn)

    # labels laid out lane-dense along N
    y2 = y.reshape(B, 1, N).astype(jnp.int32)

    partials = pl.pallas_call(
        _make_ce_kernel(N, tn),
        out_shape=jax.ShapeDtypeStruct((B, n_blocks, 128), jnp.float32),
        grid_spec=pltpu.PrefetchScalarGridSpec(
            num_scalar_prefetch=0,
            grid=(B, n_blocks),
            in_specs=[
                pl.BlockSpec((1, C, tn), lambda b, n: (b, 0, n)),
                pl.BlockSpec((1, 1, tn), lambda b, n: (b, 0, n)),
            ],
            out_specs=pl.BlockSpec((1, 1, 128), lambda b, n: (b, n, 0)),
        ),
        compiler_params=pltpu.CompilerParams(
            dimension_semantics=("parallel", "parallel")
        ),
    )(logits, y2)

    return jnp.sum(partials[:, :, 0]) / jnp.float32(M)


if __name__ == "__main__":
    key = jax.random.PRNGKey(0)

    def ref_loss(logits, y):
        B, C, N = logits.shape
        x = jnp.transpose(logits, (0, 2, 1)).reshape(-1, C).astype(jnp.float32)
        logp = jax.nn.log_softmax(x, axis=-1)
        return -jnp.mean(logp[jnp.arange(B * N), y])

    # small shapes consistent with the module: batch=2, classes=8, points=16
    k1, k2 = jax.random.split(key)
    B, C, N = 2, 8, 16
    logits = jax.random.normal(k1, (B, C, N), dtype=jnp.float32)
    y = jax.random.randint(k2, (B * N,), 0, C, dtype=jnp.int32)

    loss = jax.block_until_ready(part_seg_loss(logits, y))
    assert jnp.allclose(loss, ref_loss(logits, y), atol=1e-5, rtol=1e-5), loss

    # silent check of the tiled + ragged-lane-mask path (N not a tile multiple)
    k3, k4 = jax.random.split(k1)
    B2, C2, N2 = 2, 8, 640
    logits2 = jax.random.normal(k3, (B2, C2, N2), dtype=jnp.float32)
    y_big = jax.random.randint(k4, (B2 * N2,), 0, C2, dtype=jnp.int32)
    loss2 = jax.block_until_ready(part_seg_loss(logits2, y_big, tile_n=512))
    assert jnp.allclose(loss2, ref_loss(logits2, y_big), atol=1e-5, rtol=1e-5), loss2

    # bf16 logits path (native dtype through the DMA, f32 math inside)
    logits_bf16 = logits2.astype(jnp.bfloat16)
    loss3 = jax.block_until_ready(part_seg_loss(logits_bf16, y_big, tile_n=512))
    assert jnp.allclose(
        loss3, ref_loss(logits_bf16, y_big), atol=1e-2, rtol=1e-2
    ), loss3

    print("KERNEL_OK")
</pallas_src>

<mosaic_0001>
module attributes {stable_mosaic.version = 11 : i64} {
  func.func @ce_kernel(%arg0: i32, %arg1: i32, %arg2: memref<1x8x16xf32, #tpu.memory_space<vmem>>, %arg3: memref<1x1x16xi32, #tpu.memory_space<vmem>>, %arg4: memref<1x1x128xf32, #tpu.memory_space<vmem>>) attributes {dimension_semantics = [#tpu.dimension_semantics<parallel>, #tpu.dimension_semantics<parallel>], iteration_bounds = array<i64: 2, 1>, scalar_prefetch = 0 : i64, scratch_operands = 0 : i64, tpu.core_type = #tpu.core_type<tc>, window_params = [{transform_indices = @transform_0, window_bounds = array<i64: 1, 8, 16>}, {transform_indices = @transform_1, window_bounds = array<i64: 1, 1, 16>}, {transform_indices = @transform_2, window_bounds = array<i64: 1, 1, 128>}]} {
    %c0 = arith.constant 0 : index
    %c0_0 = arith.constant 0 : index
    %c0_1 = arith.constant 0 : index
    %0 = vector.load %arg2[%c0, %c0_0, %c0_1] : memref<1x8x16xf32, #tpu.memory_space<vmem>>, vector<1x8x16xf32>
    %c0_2 = arith.constant 0 : index
    %c0_3 = arith.constant 0 : index
    %c0_4 = arith.constant 0 : index
    %1 = vector.load %arg3[%c0_2, %c0_3, %c0_4] : memref<1x1x16xi32, #tpu.memory_space<vmem>>, vector<1x1x16xi32>
    %cst = arith.constant dense<0xFF800000> : vector<1x16xf32>
    %2 = vector.multi_reduction <maximumf>, %0, %cst [1] : vector<1x8x16xf32> to vector<1x16xf32>
    %3 = vector.shape_cast %2 : vector<1x16xf32> to vector<1x1x16xf32>
    %4 = vector.broadcast %3 : vector<1x1x16xf32> to vector<1x8x16xf32>
    %5 = arith.subf %0, %4 : vector<1x8x16xf32>
    %6 = math.exp %5 : vector<1x8x16xf32>
    %cst_5 = arith.constant dense<0.000000e+00> : vector<1x16xf32>
    %7 = vector.multi_reduction <add>, %6, %cst_5 [1] : vector<1x8x16xf32> to vector<1x16xf32>
    %8 = vector.shape_cast %7 : vector<1x16xf32> to vector<1x1x16xf32>
    %9 = math.log %8 : vector<1x1x16xf32>
    %10 = arith.addf %3, %9 : vector<1x1x16xf32>
    %11 = tpu.iota {dimensions = array<i32: 1>} : vector<1x8x16xi32>
    %12 = vector.broadcast %1 : vector<1x1x16xi32> to vector<1x8x16xi32>
    %13 = arith.cmpi eq, %11, %12 : vector<1x8x16xi32>
    %cst_6 = arith.constant 0.000000e+00 : f32
    %14 = vector.broadcast %cst_6 : f32 to vector<1x8x16xf32>
    %15 = arith.select %13, %0, %14 : vector<1x8x16xi1>, vector<1x8x16xf32>
    %cst_7 = arith.constant dense<0.000000e+00> : vector<1x16xf32>
    %16 = vector.multi_reduction <add>, %15, %cst_7 [1] : vector<1x8x16xf32> to vector<1x16xf32>
    %17 = vector.shape_cast %16 : vector<1x16xf32> to vector<1x1x16xf32>
    %18 = arith.subf %10, %17 : vector<1x1x16xf32>
    %19 = tpu.iota {dimensions = array<i32: 2>} : vector<1x1x16xi32>
    %c16_i32 = arith.constant 16 : i32
    %20 = arith.muli %arg1, %c16_i32 : i32
    %21 = vector.broadcast %20 : i32 to vector<1x1x16xi32>
    %22 = arith.addi %21, %19 : vector<1x1x16xi32>
    %c16_i32_8 = arith.constant 16 : i32
    %23 = vector.broadcast %c16_i32_8 : i32 to vector<1x1x16xi32>
    %24 = arith.cmpi slt, %22, %23 : vector<1x1x16xi32>
    %cst_9 = arith.constant 0.000000e+00 : f32
    %25 = vector.broadcast %cst_9 : f32 to vector<1x1x16xf32>
    %26 = arith.select %24, %18, %25 : vector<1x1x16xi1>, vector<1x1x16xf32>
    %27 = vector.shape_cast %26 : vector<1x1x16xf32> to vector<1x1x1x16xf32>
    %cst_10 = arith.constant dense<0.000000e+00> : vector<1xf32>
    %28 = vector.multi_reduction <add>, %27, %cst_10 [1, 2, 3] : vector<1x1x1x16xf32> to vector<1xf32>
    %29 = vector.shape_cast %28 : vector<1xf32> to vector<1x1x1x1xf32>
    %30 = vector.extract %29[0, 0, 0, 0] : f32 from vector<1x1x1x1xf32>
    %31 = vector.broadcast %30 : f32 to vector<1x1x128xf32>
    %c0_11 = arith.constant 0 : index
    %c0_12 = arith.constant 0 : index
    %c0_13 = arith.constant 0 : index
    %32 = vector.load %arg4[%c0_11, %c0_12, %c0_13] : memref<1x1x128xf32, #tpu.memory_space<vmem>>, vector<1x1x128xf32>
    tpu.vector_store %arg4[%c0_11, %c0_12, %c0_13], %31 {strides = array<i32>} : memref<1x1x128xf32, #tpu.memory_space<vmem>>, vector<1x1x128xf32>,
    return
  }
  func.func @transform_0(%arg0: i32, %arg1: i32) -> (i32, i32, i32) {
    %c0_i32 = arith.constant 0 : i32
    %c0_i32_0 = arith.constant 0 : i32
    return %arg0, %c0_i32, %arg1 : i32, i32, i32
  }
  func.func @transform_1(%arg0: i32, %arg1: i32) -> (i32, i32, i32) {
    %c0_i32 = arith.constant 0 : i32
    %c0_i32_0 = arith.constant 0 : i32
    return %arg0, %c0_i32, %arg1 : i32, i32, i32
  }
  func.func @transform_2(%arg0: i32, %arg1: i32) -> (i32, i32, i32) {
    %c0_i32 = arith.constant 0 : i32
    %c0_i32_0 = arith.constant 0 : i32
    return %arg0, %arg1, %c0_i32 : i32, i32, i32
  }
}

</mosaic_0001>

<bundles_post_ra>
// kernel: part_seg_loss.1
= control target key start
LH: loop header
LB: loop body
LE: loop exit
PB: predicated region body
PF: predicated region fallthrough
CT: control target
= control target key end

     0   :  { %7 = vsyncpa [#allocation3], 0  ;;  %s620_s0 = inlined_call_operand.hbm [shape: f32[2,8,16], index: 0, kind: input, shape index: {}]   ;;  %s621_s1 = inlined_call_operand.vmem [shape: s32[2,1,16], index: 1, kind: input, shape index: {}]   ;;  %s622_s2 = inlined_call_operand.vmem [shape: f32[2,1,128], index: 2, kind: output, shape index: {}]  }
   0x1   :  { %9 = vsyncpa [#allocation3 + $0x1], 0  ;;  %s522_s9 = smov 0   ;;  %s524_s10 = smov 0  }
   0x2   :  { %s526_s11 = smov 0   ;;  %s528_s12 = smov 0  }
   0x3   :  { %s530_s13 = smov 0   ;;  %s532_s14 = smov 0  }
   0x4 LB: > { %s353_s15 = sadd.s32 4294967295, %s505_s14   ;;  %s27_s16 = sadd.s32 1, %s501_s13  ;;  %s505_s14 = sphi %s532_s14, %s15_s14   ;;  %s501_s13 = sphi %s530_s13, %s629_s13   ;;  %s497_s12 = sphi %s528_s12, %s628_s12   ;;  %s493_s11 = sphi %s526_s11, %s627_s11   ;;  %s489_s10 = sphi %s524_s10, %s626_s10   ;;  %s485_s9 = sphi %s522_s9, %s625_s9  }
   0x5   : > { %p29_p0 = scmp.ge.s32.totalorder %s27_s16, 2  ;;  %s36_s17 = sadd.s32 1, %s493_s11 }
   0x6   : > { %p43_p1 = scmp.ne.s32.totalorder %s493_s11, %s489_s10  ;;  %p44_p2 = scmp.eq.s32.totalorder %s505_s14, 0 }
   0x7   : > { %s631_s16 = smov (%p29_p0, %s27_s16), 0  ;;  %p49_p4 = scmp.ne.s32.totalorder %s489_s10, %s485_s9 }
   0x8   : > { %p558_p3 = por %p44_p2, %p43_p1  ;;  %s31_s19 = ssub.s32 %s501_s13, %s631_s16 }
   0x9   : > { %p50_p5 = scmp.eq.s32.totalorder %s353_s15, 0  ;;  %p34_p6 = scmp.eq.s32.totalorder %s31_s19, 0 }
   0xa   : > { %p371_p8 = scmp.lt.s32.totalorder %s505_s14, 2  ;;  %s129_s22 = sand.u32 1, %s493_s11  }
   0xb   : > { %p565_p7 = por %p50_p5, %p49_p4  ;;  %s358_s23 = sshll.u32 %s501_s13, 3 }
   0xc   : > { %s571_s21 = scalar_select %p34_p6, %s493_s11, %s36_s17  }
   0xd   : > { %s357_s24 = sshll.u32 %s129_s22, 3  ;;  %s138_s27 = scalar_lea.hbm %s620_s0, %s358_s23 }
   0xe   : > { %s140_s28 = sshll.u32 %s138_s27, 4  ;;  %s133_s29 = scalar_lea.vmem [#allocation2], %s357_s24  ;;  %s141_s28 = int_to_ptr.hbm [resolvable:$true] %s140_s28 }
   0xf   : > { %s142_s30 = sshll.u32 %s133_s29, 4  ;;  %p368_p9 = pnand %p371_p8, %p558_p3  ;;  %s143_s30 = int_to_ptr.vmem [resolvable:$true] %s142_s30 }
  0x10   : > { %p359_p10 = scmp.ge.s32.totalorder %s505_s14, 1  ;;  %p156_p11 = scmp.lt.s32.totalorder %s505_s14, 3 }
  0x11   : > { %s130_s3 = scalar_lea.sflag [#allocation3], %s129_s22 }
  0x12   : > { %370 = dma.hbm_to_vmem [thread:$0]  (!%p368_p9), %s141_s28, 128, %s143_s30, %s130_s3  }
  0x13   : > { %p157_p12 = pnand %p359_p10, %p156_p11 }
  0x14   : > { %s162_s4 = sand.u32 (!%p157_p12), 1, %s489_s10  }
  0x15   : > { %160 = sbr.rel (%p157_p12) target bundleno = 260 (0x104), region = 28  ;;  %s360_s5 = sshll.u32 (!%p157_p12), %s162_s4, 3 }
  0x16   : > { %s163_s6 = scalar_lea.sflag (!%p157_p12), [#allocation3], %s162_s4  ;;  %s166_s7 = scalar_lea.vmem (!%p157_p12), [#allocation2], %s360_s5 }
  0x1a   : > { %480 = dma.done.wait (%p565_p7), %s163_s6, 128  }
  0x1b   : > { %482 = vsyncadd (%p565_p7), %s163_s6, 4294967168  ;;  %p195_p13 = scmp.lt.s32.totalorder %s497_s12, 1  ;;  %vm209_vm0 = vcmask 130048   ;;  %v207_v0 = vld [vmem:[%s166_s7] sm:$0xff]  ;;  %v230_v6 = vlaneseq  ;;  %vm250_vm3 = vcmask 122880  }
  0x1c   : > { %v210_v1 = vsel %vm209_vm0, %v207_v0, -inf }
  0x1d   : > { %s633_s12 = smov (!%p195_p13, %s497_s12), 1  ;;  %v211_v2 = vrot.slane %v210_v1, 4  ;;  %v231_v9 = vshrl.u32 %v230_v6, 7  ;;  %v244_v29 = vand.u32 127, %v230_v6 }
  0x1e   : > { %s200_s15 = scalar_lea.vmem %s621_s1, %s633_s12  ;;  %s206_s19 = scalar_lea.vmem %s622_s2, %s633_s12 }
  0x1f   : > { %v212_v3 = vmax.f32 %v210_v1, %v211_v2  ;;  %v420_v10 = vld [vmem:[%s200_s15] ss:$0 sm:$0xff]  ;;  %vm248_vm2 = vcmp.lt.s32.totalorder %v244_v29, 16 }
  0x20   : > { %vm233_vm1 = vcmp.eq.s32.totalorder %v231_v9, %v420_v10 }
  0x21   : > { %v213_v4 = vrot.slane %v212_v3, 2  ;;  %v234_v13 = vsel %vm233_vm1, %v207_v0, 0.0 }
  0x22   : > { %v235_v14 = vsel %vm209_vm0, %v234_v13, 0.0 }
  0x23   : > { %v214_v5 = vmax.f32 %v212_v3, %v213_v4  ;;  %v236_v17 = vrot.slane %v235_v14, 4 }
  0x25   : > { %v215_v7 = vrot.slane %v214_v5, 1  ;;  %v237_v20 = vadd.f32 %v236_v17, %v235_v14 }
  0x27   : > { %v216_v8 = vmax.f32 %v214_v5, %v215_v7  ;;  %v238_v23 = vrot.slane %v237_v20, 2 }
  0x29   : > { %v217_v11 = vsub.f32 %v207_v0, %v216_v8  ;;  %v239_v26 = vadd.f32 %v238_v23, %v237_v20 }
  0x2b   : > { %v218_v12 = vmul.f32 1.442695, %v217_v11  ;;  %v240_v27 = vrot.slane %v239_v26, 1 }
  0x2d   : > { %421 = vpow2.f32 %v218_v12  ;;  %v241_v31 = vadd.f32 %v240_v27, %v239_v26 }
  0x33   : > { %v422_v15 = vpop.eup %421 }
  0x34   : > { %v220_v16 = vsel %vm209_vm0, %v422_v15, 0.0 }
  0x35   : > { %v221_v18 = vrot.slane %v220_v16, 4 }
  0x37   : > { %v222_v19 = vadd.f32 %v221_v18, %v220_v16 }
  0x39   : > { %v223_v21 = vrot.slane %v222_v19, 2 }
  0x3b   : > { %v224_v22 = vadd.f32 %v223_v21, %v222_v19 }
  0x3d   : > { %v225_v24 = vrot.slane %v224_v22, 1 }
  0x3f   : > { %v226_v25 = vadd.f32 %v225_v24, %v224_v22 }
  0x41   : > { %423 = vlog2.f32 %v226_v25 }
  0x47   : > { %v424_v28 = vpop.eup %423 }
  0x48   : > { %v228_v30 = vmul.f32 0.6931472, %v424_v28 }
  0x4a   : > { %v229_v32 = vadd.f32 %v228_v30, %v216_v8 }
  0x4c   : > { %v242_v33 = vsub.f32 %v229_v32, %v241_v31 }
  0x4e   : > { %v249_v34 = vsel %vm248_vm2, %v242_v33, 0.0 }
  0x4f   : > { %v251_v35 = vsel %vm250_vm3, %v249_v34, 0.0 }
  0x50   : > { %252 = vadd.xlane.f32.xlu0 %v251_v35 }
  0xc3   : > { %v253_v36 = vpop.xlane.xlu0 %252 }
  0xc4   : > { %v254_v37 = vrot.slane %v253_v36, 4 }
  0xc6   : > { %v255_v38 = vadd.f32 %v254_v37, %v253_v36 }
  0xc8   : > { %v256_v39 = vrot.slane %v255_v38, 2 }
  0xca   : > { %v257_v40 = vadd.f32 %v256_v39, %v255_v38 }
  0xcc   : > { %v258_v41 = vrot.slane %v257_v40, 1 }
  0xce   : > { %v259_v42 = vadd.f32 %v258_v41, %v257_v40 }
  0xd0   : > { %363 = vpush %v259_v42 }
 0x101   : > { %s364_s20 = spop %363 }
 0x102   : > { %v261_v43 = vstv %s364_s20 }
 0x103   : > { %262 = vst [vmem:[%s206_s19] sm:$0x1] %v261_v43 }
 0x104 PF: > { %s15_s14 = sadd.s32 1, %s505_s14   ;;  %s625_s9 = smov %s489_s10 }
 0x105   : > { %p12_p0 = scmp.ge.s32.totalorder %s15_s14, 4   ;;  %s626_s10 = smov %s493_s11 }
 0x106   : > { %s627_s11 = smov %s571_s21  ;;  %s628_s12 = smov %s501_s13 }
 0x107   : > { %s629_s13 = smov %s631_s16  ;;  %14 = sbr.rel (!%p12_p0) target bundleno = 4 (0x4), region = 71 }
 0x10c   :  { %286 = vsyncpa [#allocation3], 1 }
 0x10d   :  { %288 = vsyncpa [#allocation3 + $0x1], 1 }

</bundles_post_ra>
